<compile_context>
chip_gen: v7x
topology: tpu7x:2x2x1
jax: 0.10.0
libtpu: 0.0.40
codegen_flags: <defaults>
</compile_context>

<pallas_src>
import functools

import jax
import jax.numpy as jnp
from jax.experimental import pallas as pl
from jax.experimental.pallas import tpu as pltpu

_LANE = 128


def _round_up(n, m):
    return (n + m - 1) // m * m


def _largest_divisor_leq(n, cap):
    cap = max(1, min(cap, n))
    for d in range(cap, 0, -1):
        if n % d == 0:
            return d
    return 1


def _sublane(itemsize):
    # Native second-minor tile: 8 for f32, 16 for bf16, 32 for 8-bit types.
    return max(8, 32 // itemsize)


def _tile2d_bytes(rows, cols, itemsize):
    # VMEM footprint of a (rows, cols) slab after (sublane, lane) tiling.
    return _round_up(rows, _sublane(itemsize)) * _round_up(cols, _LANE) * itemsize


def _vmem_limits():
    """Returns (data_budget_bytes, vmem_limit_bytes), generation aware."""
    mib = 1024 * 1024
    cap = 64 * mib                       # conservative default (v7x physical VMEM)
    try:                                 # trace-time hardware query (v5e/v6e report 128 MiB)
        cap = int(pltpu.get_tpu_info().vmem_capacity_bytes) or cap
    except Exception:
        pass
    limit = max(32 * mib, min(cap - 16 * mib, (cap * 85) // 100))
    return limit - 8 * mib, limit


def _resident_spec(shape, single_buffer):
    """BlockSpec for a small constant (weights/bias/scale-table) block kept VMEM-resident."""
    zero = (0,) * len(shape)
    idx = lambda *args: zero
    if single_buffer:
        # Constant index_map -> fetched once; single buffer frees VMEM for bigger x blocks.
        return pl.BlockSpec(shape, idx, pipeline_mode=pl.Buffered(1))
    return pl.BlockSpec(shape, idx)


# --------------------------------------------------------------------------------------
# Kernels
# --------------------------------------------------------------------------------------
def _se_fused_kernel(x_ref, w1t_ref, b1_ref, w2t_ref, b2_ref, o_ref, *, inv_hw):
    # x_ref: (Bblk, C, HW) with the TRUE HW on the lane axis. If HW % 128 != 0 the tail
    # store is masked (vst.msk) -- far cheaper than padding/slicing the tensor in HBM.
    x = x_ref[...]
    # Global average pool with f32 accumulation (no materialized f32 copy of the tile).
    pooled = jnp.sum(x, axis=-1, dtype=jnp.float32) * inv_hw          # (Bblk, C), C on lanes
    # fc1 / fc2 (the two 1x1 convs) as (Bblk, C) GEMMs; biases are row vectors.
    v2 = jnp.dot(pooled, w1t_ref[...].astype(jnp.float32),
                 preferred_element_type=jnp.float32) + b1_ref[...].astype(jnp.float32)
    v3 = jnp.dot(v2, w2t_ref[...].astype(jnp.float32),
                 preferred_element_type=jnp.float32) + b2_ref[...].astype(jnp.float32)
    o_ref[...] = (x * v3[:, :, None].astype(x.dtype)).astype(o_ref.dtype)


def _se_scale_kernel(x_ref, s_ref, o_ref):
    # x_ref: (1, C, hw_tile); s_ref: (N, C) VMEM-resident per-sample scale table.
    b = pl.program_id(0)
    s = s_ref[pl.ds(b, 1), :]                                         # (1, C)
    o_ref[...] = (x_ref[...] * s[:, :, None].astype(x_ref.dtype)).astype(o_ref.dtype)


# --------------------------------------------------------------------------------------
# Wrapper
# --------------------------------------------------------------------------------------
def _fused_call(x3, w1t, b1r, w2t, b2r, bblk, vmem_limit, single_buffer):
    N, C, HW = x3.shape
    Cmid = w1t.shape[1]
    return pl.pallas_call(
        functools.partial(_se_fused_kernel, inv_hw=1.0 / HW),
        out_shape=jax.ShapeDtypeStruct((N, C, HW), x3.dtype),
        grid=(N // bblk,),
        in_specs=[
            pl.BlockSpec((bblk, C, HW), lambda i: (i, 0, 0)),          # x block (true HW)
            _resident_spec((C, Cmid), single_buffer),                  # fc1 weight (transposed)
            _resident_spec((1, Cmid), single_buffer),                  # fc1 bias row
            _resident_spec((Cmid, C), single_buffer),                  # fc2 weight (transposed)
            _resident_spec((1, C), single_buffer),                     # fc2 bias row
        ],
        out_specs=pl.BlockSpec((bblk, C, HW), lambda i: (i, 0, 0)),
        compiler_params=pltpu.CompilerParams(
            dimension_semantics=("parallel",),
            vmem_limit_bytes=vmem_limit),
    )(x3, w1t, b1r, w2t, b2r)


def se_layer(x, w1, b1, w2, b2, *, force_two_phase=False, force_hw_tile=None):
    """x: (N, C, H, W). w1: (C//2, C), b1: (C//2, 1), w2: (C, C//2), b2: (C, 1)."""
    N, C, H, W = x.shape
    HW = H * W
    Cmid = w1.shape[0]
    x_itemsize = jnp.dtype(x.dtype).itemsize

    x3 = x.reshape(N, C, HW)                 # contiguous flatten -> no data movement, no pad

    # Kernel-friendly parameter layout: contraction dim on lanes, biases as row vectors.
    w1t = jnp.asarray(w1).T                  # (C, Cmid)
    w2t = jnp.asarray(w2).T                  # (Cmid, C)
    b1r = jnp.asarray(b1).reshape(1, Cmid)
    b2r = jnp.asarray(b2).reshape(1, C)
    p_itemsize = jnp.dtype(w1t.dtype).itemsize

    data_budget, vmem_limit = _vmem_limits()
    w_vmem = (_tile2d_bytes(C, Cmid, p_itemsize) + _tile2d_bytes(1, Cmid, p_itemsize)
              + _tile2d_bytes(Cmid, C, p_itemsize) + _tile2d_bytes(1, C, p_itemsize))
    # One batch element of x as it actually sits in VMEM (tiling rounds C up to the sublane
    # multiple and HW up to a 128-lane tile).
    per_elem = _tile2d_bytes(C, HW, x_itemsize)

    x_budget = data_budget - w_vmem          # weights single-buffered (pl.Buffered(1))
    use_fused = (not force_two_phase) and (x_budget >= 4 * per_elem)

    if use_fused:
        # ---------- single-pass fused kernel: pool + fc1 + fc2 + scale (2 HBM passes) ----------
        bmax = x_budget // (4 * per_elem)    # in + out blocks, each double-buffered
        # Aim for >= ~8 grid steps when N allows: >= 4 steps per TensorCore on 2-TC (v7x)
        # parts, and cheap pipeline overlap on 1-TC (v5e/v6e) parts; per-step overhead
        # (~0.35 us) is negligible against the per-element DMA, so smaller bblk costs nothing.
        bmax = min(bmax, max(1, N // 8)) if N >= 2 else 1
        bblk = _largest_divisor_leq(N, bmax)
        try:
            out = _fused_call(x3, w1t, b1r, w2t, b2r, bblk, vmem_limit, single_buffer=True)
        except Exception:
            # Pallas without pipeline_mode=pl.Buffered(1): re-budget for double-buffered
            # weights and retry with default pipelining.
            bmax = max(1, (data_budget - 2 * w_vmem) // (4 * per_elem))
            bmax = min(bmax, max(1, N // 8)) if N >= 2 else 1
            bblk = _largest_divisor_leq(N, bmax)
            out = _fused_call(x3, w1t, b1r, w2t, b2r, bblk, vmem_limit, single_buffer=False)
    else:
        # ---------- two-phase fallback for feature maps too large for VMEM ----------
        # Phase 1 (global mean + the two 1x1 convs) is negligible compute -> plain JAX.
        pooled = jnp.mean(x3, axis=-1, dtype=jnp.float32)                        # (N, C)
        v2 = pooled @ w1t.astype(jnp.float32) + b1r.astype(jnp.float32)
        scales = (v2 @ w2t.astype(jnp.float32) + b2r.astype(jnp.float32)).astype(x.dtype)

        # Budget the resident scale table and the double-buffered in/out spatial tiles.
        s_vmem = _tile2d_bytes(N, C, x_itemsize)
        cbytes = _round_up(C, _sublane(x_itemsize)) * x_itemsize
        hw_cap = max(_LANE, ((data_budget - s_vmem) // (4 * cbytes)) // _LANE * _LANE)
        hw_tile = force_hw_tile if force_hw_tile is not None else hw_cap
        if hw_tile >= HW:
            hw_tile = HW                    # single full-width tile, no masking needed
        n_hw = -(-HW // hw_tile)            # ragged last tile -> masked stores, no padding

        def _scale_call(single_buffer):
            return pl.pallas_call(
                _se_scale_kernel,
                out_shape=jax.ShapeDtypeStruct((N, C, HW), x.dtype),
                grid=(N, n_hw),
                in_specs=[
                    pl.BlockSpec((1, C, hw_tile), lambda b, t: (b, 0, t)),
                    _resident_spec((N, C), single_buffer),             # scales stay resident
                ],
                out_specs=pl.BlockSpec((1, C, hw_tile), lambda b, t: (b, 0, t)),
                compiler_params=pltpu.CompilerParams(
                    dimension_semantics=("parallel", "parallel"),
                    vmem_limit_bytes=vmem_limit),
            )(x3, scales)

        try:
            out = _scale_call(True)
        except Exception:
            out = _scale_call(False)

    return out.reshape(N, C, H, W)


def se_layer_reference(x, w1, b1, w2, b2):
    # Pure-JAX reference mirroring the PyTorch forward.
    pooled = jnp.mean(x, axis=(2, 3))                        # (N, C)
    v2 = pooled @ w1.T + b1[:, 0]                            # (N, C//2)
    v3 = v2 @ w2.T + b2[:, 0]                                # (N, C)
    return x * v3[:, :, None, None]


if __name__ == "__main__":
    key = jax.random.PRNGKey(0)
    cases = [
        ((2, 4, 16, 16), {}),                                             # HW multiple of 128
        ((2, 8, 7, 7), {}),                                               # masked lane tail (HW=49)
        ((2, 8, 20, 20), {"force_two_phase": True, "force_hw_tile": 128}),  # ragged HW tiling
    ]
    for (N, C, H, W), kw in cases:
        Cmid = C // 2
        kx, kw1, kb1, kw2, kb2, key = jax.random.split(key, 6)
        x = jax.random.normal(kx, (N, C, H, W), dtype=jnp.float32)
        w1 = jax.random.normal(kw1, (Cmid, C), dtype=jnp.float32) * 0.1
        b1 = jax.random.normal(kb1, (Cmid, 1), dtype=jnp.float32) * 0.1
        w2 = jax.random.normal(kw2, (C, Cmid), dtype=jnp.float32) * 0.1
        b2 = jax.random.normal(kb2, (C, 1), dtype=jnp.float32) * 0.1

        ref = se_layer_reference(x, w1, b1, w2, b2)

        out = jax.block_until_ready(se_layer(x, w1, b1, w2, b2, **kw))
        assert out.shape == (N, C, H, W)
        assert jnp.allclose(out, ref, atol=1e-5, rtol=1e-4), (N, C, H, W, kw)

        if not kw:  # also exercise the two-phase fallback path at the same shapes
            out2 = jax.block_until_ready(se_layer(x, w1, b1, w2, b2, force_two_phase=True))
            assert jnp.allclose(out2, ref, atol=1e-5, rtol=1e-4), (N, C, H, W, "two-phase")

    print("KERNEL_OK")
</pallas_src>

<mosaic_0001>
module attributes {stable_mosaic.version = 11 : i64} {
  func.func @_se_fused_kernel(%arg0: i32, %arg1: memref<1x4x256xf32, #tpu.memory_space<vmem>>, %arg2: memref<4x2xf32, #tpu.memory_space<vmem>>, %arg3: memref<1x2xf32, #tpu.memory_space<vmem>>, %arg4: memref<2x4xf32, #tpu.memory_space<vmem>>, %arg5: memref<1x4xf32, #tpu.memory_space<vmem>>, %arg6: memref<1x4x256xf32, #tpu.memory_space<vmem>>) attributes {dimension_semantics = [#tpu.dimension_semantics<parallel>], iteration_bounds = array<i64: 2>, scalar_prefetch = 0 : i64, scratch_operands = 0 : i64, tpu.core_type = #tpu.core_type<tc>, window_params = [{transform_indices = @transform_0, window_bounds = array<i64: 1, 4, 256>}, {pipeline_mode = #tpu.pipeline_mode<synchronous>, transform_indices = @transform_1, window_bounds = array<i64: 4, 2>}, {pipeline_mode = #tpu.pipeline_mode<synchronous>, transform_indices = @transform_2, window_bounds = array<i64: 1, 2>}, {pipeline_mode = #tpu.pipeline_mode<synchronous>, transform_indices = @transform_3, window_bounds = array<i64: 2, 4>}, {pipeline_mode = #tpu.pipeline_mode<synchronous>, transform_indices = @transform_4, window_bounds = array<i64: 1, 4>}, {transform_indices = @transform_5, window_bounds = array<i64: 1, 4, 256>}]} {
    %c0 = arith.constant 0 : index
    %c0_0 = arith.constant 0 : index
    %c0_1 = arith.constant 0 : index
    %0 = vector.load %arg1[%c0, %c0_0, %c0_1] : memref<1x4x256xf32, #tpu.memory_space<vmem>>, vector<1x4x256xf32>
    %cst = arith.constant dense<0.000000e+00> : vector<1x4xf32>
    %1 = vector.multi_reduction <add>, %0, %cst [2] : vector<1x4x256xf32> to vector<1x4xf32>
    %cst_2 = arith.constant 3.906250e-03 : f32
    %2 = vector.broadcast %cst_2 : f32 to vector<1x4xf32>
    %3 = arith.mulf %1, %2 : vector<1x4xf32>
    %c0_3 = arith.constant 0 : index
    %c0_4 = arith.constant 0 : index
    %4 = vector.load %arg2[%c0_3, %c0_4] : memref<4x2xf32, #tpu.memory_space<vmem>>, vector<4x2xf32>
    %cst_5 = arith.constant dense<0.000000e+00> : vector<1x2xf32>
    %5 = tpu.matmul %3, %4, %cst_5 {dimension_numbers = #tpu.dot_dimension_numbers<[1], [0], [0], [1], [0, 0, 1, 1], [], []>} : vector<1x4xf32>, vector<4x2xf32>, vector<1x2xf32> -> vector<1x2xf32>
    %c0_6 = arith.constant 0 : index
    %c0_7 = arith.constant 0 : index
    %6 = vector.load %arg3[%c0_6, %c0_7] : memref<1x2xf32, #tpu.memory_space<vmem>>, vector<1x2xf32>
    %7 = arith.addf %5, %6 : vector<1x2xf32>
    %c0_8 = arith.constant 0 : index
    %c0_9 = arith.constant 0 : index
    %8 = vector.load %arg4[%c0_8, %c0_9] : memref<2x4xf32, #tpu.memory_space<vmem>>, vector<2x4xf32>
    %cst_10 = arith.constant dense<0.000000e+00> : vector<1x4xf32>
    %9 = tpu.matmul %7, %8, %cst_10 {dimension_numbers = #tpu.dot_dimension_numbers<[1], [0], [0], [1], [0, 0, 1, 1], [], []>} : vector<1x2xf32>, vector<2x4xf32>, vector<1x4xf32> -> vector<1x4xf32>
    %c0_11 = arith.constant 0 : index
    %c0_12 = arith.constant 0 : index
    %10 = vector.load %arg5[%c0_11, %c0_12] : memref<1x4xf32, #tpu.memory_space<vmem>>, vector<1x4xf32>
    %11 = arith.addf %9, %10 : vector<1x4xf32>
    %12 = vector.shape_cast %11 : vector<1x4xf32> to vector<1x4x1xf32>
    %13 = vector.broadcast %12 : vector<1x4x1xf32> to vector<1x4x256xf32>
    %14 = arith.mulf %0, %13 : vector<1x4x256xf32>
    %c0_13 = arith.constant 0 : index
    %c0_14 = arith.constant 0 : index
    %c0_15 = arith.constant 0 : index
    %15 = vector.load %arg6[%c0_13, %c0_14, %c0_15] : memref<1x4x256xf32, #tpu.memory_space<vmem>>, vector<1x4x256xf32>
    tpu.vector_store %arg6[%c0_13, %c0_14, %c0_15], %14 {strides = array<i32>} : memref<1x4x256xf32, #tpu.memory_space<vmem>>, vector<1x4x256xf32>,
    return
  }
  func.func @transform_0(%arg0: i32) -> (i32, i32, i32) {
    %c0_i32 = arith.constant 0 : i32
    %c0_i32_0 = arith.constant 0 : i32
    %c0_i32_1 = arith.constant 0 : i32
    return %arg0, %c0_i32, %c0_i32_0 : i32, i32, i32
  }
  func.func @transform_1(%arg0: i32) -> (i32, i32) {
    %c0_i32 = arith.constant 0 : i32
    %c0_i32_0 = arith.constant 0 : i32
    %c0_i32_1 = arith.constant 0 : i32
    return %c0_i32, %c0_i32_0 : i32, i32
  }
  func.func @transform_2(%arg0: i32) -> (i32, i32) {
    %c0_i32 = arith.constant 0 : i32
    %c0_i32_0 = arith.constant 0 : i32
    %c0_i32_1 = arith.constant 0 : i32
    return %c0_i32, %c0_i32_0 : i32, i32
  }
  func.func @transform_3(%arg0: i32) -> (i32, i32) {
    %c0_i32 = arith.constant 0 : i32
    %c0_i32_0 = arith.constant 0 : i32
    %c0_i32_1 = arith.constant 0 : i32
    return %c0_i32, %c0_i32_0 : i32, i32
  }
  func.func @transform_4(%arg0: i32) -> (i32, i32) {
    %c0_i32 = arith.constant 0 : i32
    %c0_i32_0 = arith.constant 0 : i32
    %c0_i32_1 = arith.constant 0 : i32
    return %c0_i32, %c0_i32_0 : i32, i32
  }
  func.func @transform_5(%arg0: i32) -> (i32, i32, i32) {
    %c0_i32 = arith.constant 0 : i32
    %c0_i32_0 = arith.constant 0 : i32
    %c0_i32_1 = arith.constant 0 : i32
    return %arg0, %c0_i32, %c0_i32_0 : i32, i32, i32
  }
}

module attributes {stable_mosaic.version = 11 : i64} {
  func.func @_se_fused_kernel(%arg0: i32, %arg1: memref<1x4x256xf32, #tpu.memory_space<vmem>>, %arg2: memref<4x2xf32, #tpu.memory_space<vmem>>, %arg3: memref<1x2xf32, #tpu.memory_space<vmem>>, %arg4: memref<2x4xf32, #tpu.memory_space<vmem>>, %arg5: memref<1x4xf32, #tpu.memory_space<vmem>>, %arg6: memref<1x4x256xf32, #tpu.memory_space<vmem>>) attributes {dimension_semantics = [#tpu.dimension_semantics<parallel>], iteration_bounds = array<i64: 2>, scalar_prefetch = 0 : i64, scratch_operands = 0 : i64, tpu.core_type = #tpu.core_type<tc>, window_params = [{transform_indices = @transform_0, window_bounds = array<i64: 1, 4, 256>}, {pipeline_mode = #tpu.pipeline_mode<synchronous>, transform_indices = @transform_1, window_bounds = array<i64: 4, 2>}, {pipeline_mode = #tpu.pipeline_mode<synchronous>, transform_indices = @transform_2, window_bounds = array<i64: 1, 2>}, {pipeline_mode = #tpu.pipeline_mode<synchronous>, transform_indices = @transform_3, window_bounds = array<i64: 2, 4>}, {pipeline_mode = #tpu.pipeline_mode<synchronous>, transform_indices = @transform_4, window_bounds = array<i64: 1, 4>}, {transform_indices = @transform_5, window_bounds = array<i64: 1, 4, 256>}]} {
    %c0 = arith.constant 0 : index
    %c0_0 = arith.constant 0 : index
    %c0_1 = arith.constant 0 : index
    %0 = vector.load %arg1[%c0, %c0_0, %c0_1] : memref<1x4x256xf32, #tpu.memory_space<vmem>>, vector<1x4x256xf32>
    %cst = arith.constant dense<0.000000e+00> : vector<1x4xf32>
    %1 = vector.multi_reduction <add>, %0, %cst [2] : vector<1x4x256xf32> to vector<1x4xf32>
    %cst_2 = arith.constant 3.906250e-03 : f32
    %2 = vector.broadcast %cst_2 : f32 to vector<1x4xf32>
    %3 = arith.mulf %1, %2 : vector<1x4xf32>
    %c0_3 = arith.constant 0 : index
    %c0_4 = arith.constant 0 : index
    %4 = vector.load %arg2[%c0_3, %c0_4] : memref<4x2xf32, #tpu.memory_space<vmem>>, vector<4x2xf32>
    %cst_5 = arith.constant dense<0.000000e+00> : vector<1x2xf32>
    %5 = tpu.matmul %3, %4, %cst_5 {dimension_numbers = #tpu.dot_dimension_numbers<[1], [0], [0], [1], [0, 0, 1, 1], [], []>} : vector<1x4xf32>, vector<4x2xf32>, vector<1x2xf32> -> vector<1x2xf32>
    %c0_6 = arith.constant 0 : index
    %c0_7 = arith.constant 0 : index
    %6 = vector.load %arg3[%c0_6, %c0_7] : memref<1x2xf32, #tpu.memory_space<vmem>>, vector<1x2xf32>
    %7 = arith.addf %5, %6 : vector<1x2xf32>
    %c0_8 = arith.constant 0 : index
    %c0_9 = arith.constant 0 : index
    %8 = vector.load %arg4[%c0_8, %c0_9] : memref<2x4xf32, #tpu.memory_space<vmem>>, vector<2x4xf32>
    %cst_10 = arith.constant dense<0.000000e+00> : vector<1x4xf32>
    %9 = tpu.matmul %7, %8, %cst_10 {dimension_numbers = #tpu.dot_dimension_numbers<[1], [0], [0], [1], [0, 0, 1, 1], [], []>} : vector<1x2xf32>, vector<2x4xf32>, vector<1x4xf32> -> vector<1x4xf32>
    %c0_11 = arith.constant 0 : index
    %c0_12 = arith.constant 0 : index
    %10 = vector.load %arg5[%c0_11, %c0_12] : memref<1x4xf32, #tpu.memory_space<vmem>>, vector<1x4xf32>
    %11 = arith.addf %9, %10 : vector<1x4xf32>
    %12 = vector.shape_cast %11 : vector<1x4xf32> to vector<1x4x1xf32>
    %13 = vector.broadcast %12 : vector<1x4x1xf32> to vector<1x4x256xf32>
    %14 = arith.mulf %0, %13 : vector<1x4x256xf32>
    %c0_13 = arith.constant 0 : index
    %c0_14 = arith.constant 0 : index
    %c0_15 = arith.constant 0 : index
    %15 = vector.load %arg6[%c0_13, %c0_14, %c0_15] : memref<1x4x256xf32, #tpu.memory_space<vmem>>, vector<1x4x256xf32>
    tpu.vector_store %arg6[%c0_13, %c0_14, %c0_15], %14 {strides = array<i32>} : memref<1x4x256xf32, #tpu.memory_space<vmem>>, vector<1x4x256xf32>,
    return
  }
  func.func @transform_0(%arg0: i32) -> (i32, i32, i32) {
    %c0_i32 = arith.constant 0 : i32
    %c0_i32_0 = arith.constant 0 : i32
    %c0_i32_1 = arith.constant 0 : i32
    return %arg0, %c0_i32, %c0_i32_0 : i32, i32, i32
  }
  func.func @transform_1(%arg0: i32) -> (i32, i32) {
    %c0_i32 = arith.constant 0 : i32
    %c0_i32_0 = arith.constant 0 : i32
    %c0_i32_1 = arith.constant 0 : i32
    return %c0_i32, %c0_i32_0 : i32, i32
  }
  func.func @transform_2(%arg0: i32) -> (i32, i32) {
    %c0_i32 = arith.constant 0 : i32
    %c0_i32_0 = arith.constant 0 : i32
    %c0_i32_1 = arith.constant 0 : i32
    return %c0_i32, %c0_i32_0 : i32, i32
  }
  func.func @transform_3(%arg0: i32) -> (i32, i32) {
    %c0_i32 = arith.constant 0 : i32
    %c0_i32_0 = arith.constant 0 : i32
    %c0_i32_1 = arith.constant 0 : i32
    return %c0_i32, %c0_i32_0 : i32, i32
  }
  func.func @transform_4(%arg0: i32) -> (i32, i32) {
    %c0_i32 = arith.constant 0 : i32
    %c0_i32_0 = arith.constant 0 : i32
    %c0_i32_1 = arith.constant 0 : i32
    return %c0_i32, %c0_i32_0 : i32, i32
  }
  func.func @transform_5(%arg0: i32) -> (i32, i32, i32) {
    %c0_i32 = arith.constant 0 : i32
    %c0_i32_0 = arith.constant 0 : i32
    %c0_i32_1 = arith.constant 0 : i32
    return %arg0, %c0_i32, %c0_i32_0 : i32, i32, i32
  }
}

</mosaic_0001>

<bundles_post_ra>
// kernel: tpu_custom_call.1
= control target key start
LH: loop header
LB: loop body
LE: loop exit
PB: predicated region body
PF: predicated region fallthrough
CT: control target
= control target key end

     0   :  { %10 = vsyncpa [#allocation3], 0  ;;  %s914_s0 = inlined_call_operand.hbm [shape: f32[2,4,256], index: 0, kind: input, shape index: {}]   ;;  %s915_s1 = inlined_call_operand.vmem [shape: f32[4,2], index: 1, kind: input, shape index: {}]   ;;  %s916_s2 = inlined_call_operand.vmem [shape: f32[1,2], index: 2, kind: input, shape index: {}]   ;;  %s917_s3 = inlined_call_operand.vmem [shape: f32[2,4], index: 3, kind: input, shape index: {}]   ;;  %s918_s4 = inlined_call_operand.vmem [shape: f32[1,4], index: 4, kind: input, shape index: {}]   ;;  %s919_s5 = inlined_call_operand.hbm [shape: f32[2,4,256], index: 5, kind: output, shape index: {}]  }
   0x1   :  { %12 = vsyncpa [#allocation3 + $0x1], 0 }
   0x2   :  { %13 = vsyncpa [#allocation4], 0 }
   0x3   :  { %15 = vsyncpa [#allocation4 + $0x1], 0  ;;  %s737_s18 = smov 0   ;;  %s739_s19 = smov 0  }
   0x4   :  { %s741_s20 = smov 0   ;;  %s743_s21 = smov 0  }
   0x5 LB: > { %s758_s22 = sadd.s32 4294967295, %s700_s21   ;;  %s520_s23 = sadd.s32 4294967294, %s700_s21   ;;  %s700_s21 = sphi %s743_s21, %s934_s21   ;;  %s696_s20 = sphi %s741_s20, %s933_s20   ;;  %s692_s19 = sphi %s739_s19, %s932_s19   ;;  %s688_s18 = sphi %s737_s18, %s931_s18  }
   0x6   : > { %s762_s24 = sadd.s32 1, %s700_s21   ;;  %s28_s25 = sadd.s32 1, %s696_s20 }
   0x7   : > { %s25_s26 = ssub.s32 %s700_s21, %s762_s24  ;;  %p35_p0 = scmp.ne.s32.totalorder %s696_s20, %s692_s19 }
   0x8   : > { %p26_p1 = scmp.eq.s32.totalorder %s25_s26, 0  ;;  %p36_p2 = scmp.eq.s32.totalorder %s700_s21, 0 }
   0x9   : > { %p41_p3 = scmp.ne.s32.totalorder %s692_s19, %s688_s18  ;;  %p42_p4 = scmp.eq.s32.totalorder %s758_s22, 0 }
   0xa   : > { %s774_s27 = scalar_select %p26_p1, %s696_s20, %s28_s25  }
   0xb   : > { %p776_p5 = por %p36_p2, %p35_p0  ;;  %p780_p6 = por %p42_p4, %p41_p3 }
   0xc   : > { %p149_p7 = scmp.eq.s32.totalorder %s758_s22, 1  ;;  %p155_p8 = scmp.eq.s32.totalorder %s520_s23, 1 }
   0xd   : > { %p566_p10 = scmp.lt.s32.totalorder %s700_s21, 2  ;;  %s187_s7 = sand.u32 1, %s696_s20  }
   0xe   : > { %p787_p11 = por %p149_p7, %p35_p0  ;;  %p791_p12 = por %p155_p8, %p41_p3 }
   0xf   : > { %s538_s8 = sshll.u32 %s700_s21, 7  ;;  %s523_s9 = sshll.u32 %s187_s7, 3 }
  0x10   : > { %s923_s30 = scalar_select %p787_p11, 1, 0 }
  0x11   : > { %s924_s6 = scalar_select %p791_p12, 1, 0 }
  0x12   : > { %s800_s12 = scalar_lea.hbm %s914_s0, %s538_s8  ;;  %s191_s13 = scalar_lea.vmem [#allocation2], %s523_s9 }
  0x13   : > { %s199_s14 = sshll.u32 %s191_s13, 4  ;;  %p804_p13 = pnand %p566_p10, %p776_p5  ;;  %s808_s14 = int_to_ptr.vmem [resolvable:$true] %s199_s14 }
  0x14   : > { %s188_s16 = scalar_lea.sflag [#allocation3], %s187_s7  ;;  %s604_s17 = scalar_lea.hbm %s800_s12, 128 }
  0x15   : > { %p605_p2 = scmp.ne.s32.totalorder %s800_s12, %s604_s17  ;;  %p606_p3 = pneg %p804_p13 }
  0x16   : > { %s609_s26 = scalar_lea.hbm %s914_s0, 256  ;;  %p610_p5 = scmp.lt.u32.totalorder %s800_s12, %s914_s0 }
  0x17   : > { %p607_p4 = pnand %p606_p3, %p605_p2  ;;  %p611_p8 = scmp.lt.u32.totalorder %s609_s26, %s604_s17 }
  0x18   : > { %p613_p9 = scmp.lt.u32.totalorder %s604_s17, %s800_s12 }
  0x19   : > { %p608_p7 = pneg %p607_p4  ;;  %p612_p10 = por %p611_p8, %p610_p5 }
  0x1b   : > { %p614_p0 = por %p613_p9, %p612_p10 }
  0x1d   : > { %p615_p1 = pnand %p614_p0, %p608_p7 }
  0x1f   : > { %618 = shalt.err (!%p615_p1)
}
  0x20   : > { %s619_s7 = scalar_lea.vmem %s808_s14, 128  ;;  %s702_s9 = smov [#allocation2]  }
  0x21   : > { %p620_p2 = scmp.ne.s32.totalorder %s808_s14, %s619_s7  ;;  %s624_s10 = sshll.u32 %s702_s9, 4  ;;  %s625_s10 = int_to_ptr.vmem [resolvable:$false] %s624_s10 }
  0x22   : > { %s626_s11 = scalar_lea.vmem %s625_s10, 256  ;;  %p627_p11 = scmp.lt.s32.totalorder %s808_s14, %s625_s10 }
  0x23   : > { %p622_p4 = pnand %p620_p2, %p606_p3  ;;  %p628_p5 = scmp.lt.s32.totalorder %s626_s11, %s619_s7 }
  0x25   : > { %p623_p12 = pneg %p622_p4  ;;  %p629_p8 = por %p628_p5, %p627_p11 }
  0x27   : > { %p630_p9 = pnand %p629_p8, %p623_p12 }
  0x29   : > { %633 = shalt.err (!%p630_p9)
}
  0x2a   : > { %561 = dma.hbm_to_vmem [thread:$0]  (!%p804_p13), %s800_s12, 128, %s808_s14, %s188_s16  }
  0x2b   : > { %p926_p0 = scmp.lt.s32.totalorder %s700_s21, 3  ;;  %p927_p1 = scmp.ge.s32.totalorder %s700_s21, 1 }
  0x2d   : > { %p205_p3 = pnand %p927_p1, %p926_p0 }
  0x2e   : > { %s842_s13 = sand.u32 (!%p205_p3), 1, %s692_s19  }
  0x2f   : > { %208 = sbr.rel (%p205_p3) target bundleno = 770 (0x302), region = 40  ;;  %s527_s17 = sshll.u32 (!%p205_p3), %s842_s13, 3 }
  0x30   : > { %s211_s23 = scalar_lea.sflag (!%p205_p3), [#allocation3], %s842_s13  ;;  %s214_s15 = scalar_lea.vmem (!%p205_p3), [#allocation2], %s527_s17 }
  0x36   : > { %679 = dma.done.wait (%p780_p6), %s211_s23, 128  }
  0x37   : > { %681 = vsyncadd (%p780_p6), %s211_s23, 4294967168  ;;  %vm245_vm0 = vcmask 1043456   ;;  %v241_v0 = vld [vmem:[%s214_s15] sm:$0xff]  ;;  %v703_v5 = vmov 0.0   ;;  %vm704_vm1 = vmmov 0   ;;  %v255_v7 = vlaneseq  ;;  %s539_s7 = sshll.u32 %s758_s22, 7 }
  0x38   : > { %v243_v1 = vcombine.high %v241_v0, %v241_v0  ;;  %v246_v2 = vsel %vm245_vm0, %v241_v0, 0.0  ;;  %544 = vmatprep.subr.mxu0 %v703_v5  ;;  %v252_v6 = vld [vmem:[%s915_s1] sm:$0xf]  ;;  %549 = vmatprep.subr.mxu1 %v703_v5  ;;  %vm261_vm2 = vcmask 31744   ;;  %vm343_vm3 = vcmask 1041408   ;;  %s240_s9 = scalar_lea.vmem [#allocation5], %s527_s17  ;;  %s870_s15 = scalar_lea.hbm %s919_s5, %s539_s7 }
  0x39   : > { %545 = vmatpush3.msk.msra.mxu0 %vm245_vm0, %v252_v6  ;;  %546 = vmatprep.mubr.msk.f32.mxu0 %vm704_vm1, %v703_v5  ;;  %v256_v8 = vand.u32 127, %v255_v7  ;;  %v258_v9 = vshrl.u32 %v255_v7, 7  ;;  %v337_v14 = vld [vmem:[%s917_s3] sm:$0x3]  ;;  %vm339_vm4 = vcmask 15360   ;;  %s450_s10 = sshll.u32 %s240_s9, 4  ;;  %s872_s10 = int_to_ptr.vmem [resolvable:$true] %s450_s10 }
  0x3a   : > { %v247_v3 = vsel %vm245_vm0, %v243_v1, 0.0  ;;  %551 = vmatprep.mubr.msk.f32.mxu1 %vm704_vm1, %v703_v5  ;;  %550 = vmatpush3.msk.msra.mxu1 %vm343_vm3, %v337_v14  ;;  %v253_v15 = vld [vmem:[%s916_s2] sm:$0x1]  ;;  %v705_v25 = vmov 839922192   ;;  %s436_s12 = scalar_lea.sflag [#allocation4], %s842_s13 }
  0x3b   : > { %v248_v4 = vadd.f32 %v247_v3, %v246_v2  ;;  %v259_v10 = vsub.s32 %v256_v8, %v258_v9  ;;  %v338_v19 = vld [vmem:[%s918_s4] sm:$0x1]  ;;  %v419_v20 = vsub.s32 0, %v258_v9  ;;  %v426_v26 = vunpack.c.l.s4 %v705_v25  ;;  %s634_s14 = scalar_lea.vmem %s872_s10, 128  ;;  %p928_p11 = scmp.ne.s32.totalorder %s923_s30, 0 }
  0x3c   : > { %p635_p6 = scmp.ne.s32.totalorder %s872_s10, %s634_s14  ;;  %s706_s22 = smov [#allocation5]  }
  0x3d   : > { %249 = vadd.xlane.f32.xlu0 %v248_v4  ;;  %v427_v27 = vunpack.c.0.s8 %v426_v26  ;;  %s638_s17 = sshll.u32 %s706_s22, 4  ;;  %s639_s17 = int_to_ptr.vmem [resolvable:$false] %s638_s17 }
  0x3e   : > { %p636_p12 = pnand %p635_p6, %p928_p11  ;;  %s640_s29 = scalar_lea.vmem %s639_s17, 256 }
  0x3f   : > { %v430_v28 = vsub.s32 %v427_v27, %v258_v9  ;;  %p641_p7 = scmp.lt.s32.totalorder %s872_s10, %s639_s17  ;;  %p642_p10 = scmp.lt.s32.totalorder %s640_s29, %s634_s14 }
  0x40   : > { %p637_p13 = pneg %p636_p12 }
  0x41   : > { %p643_p2 = por %p642_p10, %p641_p7 }
  0x43   : > { %p644_p4 = pnand %p643_p2, %p637_p13 }
  0xca   : > { %v250_v11 = vpop.xlane.xlu0 %249 }
  0xcb   : > { %v251_v12 = vmul.f32 0.00390625, %v250_v11 }
  0xcd   : > { %v260_v13 = vrot.slane %v251_v12, %v259_v10 }
  0xcf   : > { %547 = vmatmul.mubr.msk.f32.vlgmr.msra.gmra.mrb[0].mxu0 %vm261_vm2, %v260_v13 }
 0x1a2   : > { %v333_v16 = vpop.f32.mrb[0].mxu0 }
 0x1a3   : > { %v334_v17 = vadd.f32 %v333_v16, %v253_v15  ;;  %v548_v18 = vpop.f32.mrb[1].mxu0 }
 0x1a5   : > { %552 = vmatmul.mubr.msk.f32.vlgmr.msra.gmra.mrb[0].mxu1 %vm339_vm4, %v334_v17 }
 0x278   : > { %v413_v21 = vpop.f32.mrb[0].mxu1 }
 0x279   : > { %v414_v22 = vadd.f32 %v413_v21, %v338_v19  ;;  %v553_v23 = vpop.f32.mrb[1].mxu1 }
 0x27b   : > { %v420_v24 = vrot.slane %v414_v22, %v419_v20 }
 0x27d   : > { %422 = vbcast.lane.b32.xlu0 %v420_v24, 256 }
 0x2ef   : > { %v423_v29 = vpop.permute.xlu0 %422 }
 0x2f0   : > { %v431_v30 = vrot.slane %v423_v29, %v430_v28 }
 0x2f2   : > { %v433_v31 = vmul.f32 %v431_v30, %v241_v0 }
 0x2f4   : > { %434 = vst [vmem:[%s240_s9] sm:$0xff] %v433_v31 }
 0x2f5   : > { %647 = shalt.err (!%p644_p4)
}
 0x2f6   : > { %s648_s13 = scalar_lea.hbm %s870_s15, 128  ;;  %s652_s26 = scalar_lea.hbm %s919_s5, 256 }
 0x2f7   : > { %p649_p5 = scmp.ne.s32.totalorder %s870_s15, %s648_s13  ;;  %p653_p0 = scmp.lt.u32.totalorder %s870_s15, %s919_s5 }
 0x2f8   : > { %p654_p1 = scmp.lt.u32.totalorder %s652_s26, %s648_s13  ;;  %p656_p6 = scmp.lt.u32.totalorder %s648_s13, %s870_s15 }
 0x2f9   : > { %p650_p8 = pnand %p649_p5, %p928_p11 }
 0x2fa   : > { %p655_p3 = por %p654_p1, %p653_p0 }
 0x2fb   : > { %p651_p9 = pneg %p650_p8 }
 0x2fc   : > { %p657_p12 = por %p656_p6, %p655_p3 }
 0x2fe   : > { %p658_p13 = pnand %p657_p12, %p651_p9 }
 0x300   : > { %661 = shalt.err (!%p658_p13)
}
 0x301   : > { %556 = dma.vmem_to_hbm [thread:$0]  (%p928_p11), %s872_s10, 128, %s870_s15, %s436_s12  }
 0x302 PF: > { %s462_s7 = sand.u32 1, %s688_s18   ;;  %p929_p7 = scmp.ne.s32.totalorder %s924_s6, 0 }
 0x303   : > { %p930_p10 = scmp.ge.s32.totalorder %s700_s21, 2  ;;  %s463_s9 = scalar_lea.sflag [#allocation4], %s462_s7 }
 0x305   : > { %p563_p2 = pnand %p930_p10, %p929_p7 }
 0x307   : > { %683 = dma.done.wait (!%p563_p2), %s463_s9, 128  }
 0x308   : > { %685 = vsyncadd (!%p563_p2), %s463_s9, 4294967168  ;;  %p18_p4 = scmp.ge.s32.totalorder %s762_s24, 4   ;;  %s931_s18 = smov %s692_s19 }
 0x309   : > { %s932_s19 = smov %s696_s20  ;;  %s933_s20 = smov %s774_s27 }
 0x30a   : > { %s934_s21 = smov %s762_s24  ;;  %20 = sbr.rel (!%p18_p4) target bundleno = 5 (0x5), region = 85 }
 0x311   :  { %468 = vsyncpa [#allocation3], 1 }
 0x312   :  { %470 = vsyncpa [#allocation3 + $0x1], 1 }
 0x313   :  { %471 = vsyncpa [#allocation4], 1 }
 0x314   :  { %473 = vsyncpa [#allocation4 + $0x1], 1 }

// kernel: tpu_custom_call.1
= control target key start
LH: loop header
LB: loop body
LE: loop exit
PB: predicated region body
PF: predicated region fallthrough
CT: control target
= control target key end

     0   :  { %10 = vsyncpa [#allocation3], 0  ;;  %s914_s0 = inlined_call_operand.hbm [shape: f32[2,4,256], index: 0, kind: input, shape index: {}]   ;;  %s915_s1 = inlined_call_operand.vmem [shape: f32[4,2], index: 1, kind: input, shape index: {}]   ;;  %s916_s2 = inlined_call_operand.vmem [shape: f32[1,2], index: 2, kind: input, shape index: {}]   ;;  %s917_s3 = inlined_call_operand.vmem [shape: f32[2,4], index: 3, kind: input, shape index: {}]   ;;  %s918_s4 = inlined_call_operand.vmem [shape: f32[1,4], index: 4, kind: input, shape index: {}]   ;;  %s919_s5 = inlined_call_operand.hbm [shape: f32[2,4,256], index: 5, kind: output, shape index: {}]  }
   0x1   :  { %12 = vsyncpa [#allocation3 + $0x1], 0 }
   0x2   :  { %13 = vsyncpa [#allocation4], 0 }
   0x3   :  { %15 = vsyncpa [#allocation4 + $0x1], 0  ;;  %s737_s18 = smov 0   ;;  %s739_s19 = smov 0  }
   0x4   :  { %s741_s20 = smov 0   ;;  %s743_s21 = smov 0  }
   0x5 LB: > { %s758_s22 = sadd.s32 4294967295, %s700_s21   ;;  %s520_s23 = sadd.s32 4294967294, %s700_s21   ;;  %s700_s21 = sphi %s743_s21, %s934_s21   ;;  %s696_s20 = sphi %s741_s20, %s933_s20   ;;  %s692_s19 = sphi %s739_s19, %s932_s19   ;;  %s688_s18 = sphi %s737_s18, %s931_s18  }
   0x6   : > { %s762_s24 = sadd.s32 1, %s700_s21   ;;  %s28_s25 = sadd.s32 1, %s696_s20 }
   0x7   : > { %s25_s26 = ssub.s32 %s700_s21, %s762_s24  ;;  %p35_p0 = scmp.ne.s32.totalorder %s696_s20, %s692_s19 }
   0x8   : > { %p26_p1 = scmp.eq.s32.totalorder %s25_s26, 0  ;;  %p36_p2 = scmp.eq.s32.totalorder %s700_s21, 0 }
   0x9   : > { %p41_p3 = scmp.ne.s32.totalorder %s692_s19, %s688_s18  ;;  %p42_p4 = scmp.eq.s32.totalorder %s758_s22, 0 }
   0xa   : > { %s774_s27 = scalar_select %p26_p1, %s696_s20, %s28_s25  }
   0xb   : > { %p776_p5 = por %p36_p2, %p35_p0  ;;  %p780_p6 = por %p42_p4, %p41_p3 }
   0xc   : > { %p149_p7 = scmp.eq.s32.totalorder %s758_s22, 1  ;;  %p155_p8 = scmp.eq.s32.totalorder %s520_s23, 1 }
   0xd   : > { %p566_p10 = scmp.lt.s32.totalorder %s700_s21, 2  ;;  %s187_s7 = sand.u32 1, %s696_s20  }
   0xe   : > { %p787_p11 = por %p149_p7, %p35_p0  ;;  %p791_p12 = por %p155_p8, %p41_p3 }
   0xf   : > { %s538_s8 = sshll.u32 %s700_s21, 7  ;;  %s523_s9 = sshll.u32 %s187_s7, 3 }
  0x10   : > { %s923_s30 = scalar_select %p787_p11, 1, 0 }
  0x11   : > { %s924_s6 = scalar_select %p791_p12, 1, 0 }
  0x12   : > { %s800_s12 = scalar_lea.hbm %s914_s0, %s538_s8  ;;  %s191_s13 = scalar_lea.vmem [#allocation2], %s523_s9 }
  0x13   : > { %s199_s14 = sshll.u32 %s191_s13, 4  ;;  %p804_p13 = pnand %p566_p10, %p776_p5  ;;  %s808_s14 = int_to_ptr.vmem [resolvable:$true] %s199_s14 }
  0x14   : > { %s188_s16 = scalar_lea.sflag [#allocation3], %s187_s7  ;;  %s604_s17 = scalar_lea.hbm %s800_s12, 128 }
  0x15   : > { %p605_p2 = scmp.ne.s32.totalorder %s800_s12, %s604_s17  ;;  %p606_p3 = pneg %p804_p13 }
  0x16   : > { %s609_s26 = scalar_lea.hbm %s914_s0, 256  ;;  %p610_p5 = scmp.lt.u32.totalorder %s800_s12, %s914_s0 }
  0x17   : > { %p607_p4 = pnand %p606_p3, %p605_p2  ;;  %p611_p8 = scmp.lt.u32.totalorder %s609_s26, %s604_s17 }
  0x18   : > { %p613_p9 = scmp.lt.u32.totalorder %s604_s17, %s800_s12 }
  0x19   : > { %p608_p7 = pneg %p607_p4  ;;  %p612_p10 = por %p611_p8, %p610_p5 }
  0x1b   : > { %p614_p0 = por %p613_p9, %p612_p10 }
  0x1d   : > { %p615_p1 = pnand %p614_p0, %p608_p7 }
  0x1f   : > { %618 = shalt.err (!%p615_p1)
}
  0x20   : > { %s619_s7 = scalar_lea.vmem %s808_s14, 128  ;;  %s702_s9 = smov [#allocation2]  }
  0x21   : > { %p620_p2 = scmp.ne.s32.totalorder %s808_s14, %s619_s7  ;;  %s624_s10 = sshll.u32 %s702_s9, 4  ;;  %s625_s10 = int_to_ptr.vmem [resolvable:$false] %s624_s10 }
  0x22   : > { %s626_s11 = scalar_lea.vmem %s625_s10, 256  ;;  %p627_p11 = scmp.lt.s32.totalorder %s808_s14, %s625_s10 }
  0x23   : > { %p622_p4 = pnand %p620_p2, %p606_p3  ;;  %p628_p5 = scmp.lt.s32.totalorder %s626_s11, %s619_s7 }
  0x25   : > { %p623_p12 = pneg %p622_p4  ;;  %p629_p8 = por %p628_p5, %p627_p11 }
  0x27   : > { %p630_p9 = pnand %p629_p8, %p623_p12 }
  0x29   : > { %633 = shalt.err (!%p630_p9)
}
  0x2a   : > { %561 = dma.hbm_to_vmem [thread:$0]  (!%p804_p13), %s800_s12, 128, %s808_s14, %s188_s16  }
  0x2b   : > { %p926_p0 = scmp.lt.s32.totalorder %s700_s21, 3  ;;  %p927_p1 = scmp.ge.s32.totalorder %s700_s21, 1 }
  0x2d   : > { %p205_p3 = pnand %p927_p1, %p926_p0 }
  0x2e   : > { %s842_s13 = sand.u32 (!%p205_p3), 1, %s692_s19  }
  0x2f   : > { %208 = sbr.rel (%p205_p3) target bundleno = 770 (0x302), region = 40  ;;  %s527_s17 = sshll.u32 (!%p205_p3), %s842_s13, 3 }
  0x30   : > { %s211_s23 = scalar_lea.sflag (!%p205_p3), [#allocation3], %s842_s13  ;;  %s214_s15 = scalar_lea.vmem (!%p205_p3), [#allocation2], %s527_s17 }
  0x36   : > { %679 = dma.done.wait (%p780_p6), %s211_s23, 128  }
  0x37   : > { %681 = vsyncadd (%p780_p6), %s211_s23, 4294967168  ;;  %vm245_vm0 = vcmask 1043456   ;;  %v241_v0 = vld [vmem:[%s214_s15] sm:$0xff]  ;;  %v703_v5 = vmov 0.0   ;;  %vm704_vm1 = vmmov 0   ;;  %v255_v7 = vlaneseq  ;;  %s539_s7 = sshll.u32 %s758_s22, 7 }
  0x38   : > { %v243_v1 = vcombine.high %v241_v0, %v241_v0  ;;  %v246_v2 = vsel %vm245_vm0, %v241_v0, 0.0  ;;  %544 = vmatprep.subr.mxu0 %v703_v5  ;;  %v252_v6 = vld [vmem:[%s915_s1] sm:$0xf]  ;;  %549 = vmatprep.subr.mxu1 %v703_v5  ;;  %vm261_vm2 = vcmask 31744   ;;  %vm343_vm3 = vcmask 1041408   ;;  %s240_s9 = scalar_lea.vmem [#allocation5], %s527_s17  ;;  %s870_s15 = scalar_lea.hbm %s919_s5, %s539_s7 }
  0x39   : > { %545 = vmatpush3.msk.msra.mxu0 %vm245_vm0, %v252_v6  ;;  %546 = vmatprep.mubr.msk.f32.mxu0 %vm704_vm1, %v703_v5  ;;  %v256_v8 = vand.u32 127, %v255_v7  ;;  %v258_v9 = vshrl.u32 %v255_v7, 7  ;;  %v337_v14 = vld [vmem:[%s917_s3] sm:$0x3]  ;;  %vm339_vm4 = vcmask 15360   ;;  %s450_s10 = sshll.u32 %s240_s9, 4  ;;  %s872_s10 = int_to_ptr.vmem [resolvable:$true] %s450_s10 }
  0x3a   : > { %v247_v3 = vsel %vm245_vm0, %v243_v1, 0.0  ;;  %551 = vmatprep.mubr.msk.f32.mxu1 %vm704_vm1, %v703_v5  ;;  %550 = vmatpush3.msk.msra.mxu1 %vm343_vm3, %v337_v14  ;;  %v253_v15 = vld [vmem:[%s916_s2] sm:$0x1]  ;;  %v705_v25 = vmov 839922192   ;;  %s436_s12 = scalar_lea.sflag [#allocation4], %s842_s13 }
  0x3b   : > { %v248_v4 = vadd.f32 %v247_v3, %v246_v2  ;;  %v259_v10 = vsub.s32 %v256_v8, %v258_v9  ;;  %v338_v19 = vld [vmem:[%s918_s4] sm:$0x1]  ;;  %v419_v20 = vsub.s32 0, %v258_v9  ;;  %v426_v26 = vunpack.c.l.s4 %v705_v25  ;;  %s634_s14 = scalar_lea.vmem %s872_s10, 128  ;;  %p928_p11 = scmp.ne.s32.totalorder %s923_s30, 0 }
  0x3c   : > { %p635_p6 = scmp.ne.s32.totalorder %s872_s10, %s634_s14  ;;  %s706_s22 = smov [#allocation5]  }
  0x3d   : > { %249 = vadd.xlane.f32.xlu0 %v248_v4  ;;  %v427_v27 = vunpack.c.0.s8 %v426_v26  ;;  %s638_s17 = sshll.u32 %s706_s22, 4  ;;  %s639_s17 = int_to_ptr.vmem [resolvable:$false] %s638_s17 }
  0x3e   : > { %p636_p12 = pnand %p635_p6, %p928_p11  ;;  %s640_s29 = scalar_lea.vmem %s639_s17, 256 }
  0x3f   : > { %v430_v28 = vsub.s32 %v427_v27, %v258_v9  ;;  %p641_p7 = scmp.lt.s32.totalorder %s872_s10, %s639_s17  ;;  %p642_p10 = scmp.lt.s32.totalorder %s640_s29, %s634_s14 }
  0x40   : > { %p637_p13 = pneg %p636_p12 }
  0x41   : > { %p643_p2 = por %p642_p10, %p641_p7 }
  0x43   : > { %p644_p4 = pnand %p643_p2, %p637_p13 }
  0xca   : > { %v250_v11 = vpop.xlane.xlu0 %249 }
  0xcb   : > { %v251_v12 = vmul.f32 0.00390625, %v250_v11 }
  0xcd   : > { %v260_v13 = vrot.slane %v251_v12, %v259_v10 }
  0xcf   : > { %547 = vmatmul.mubr.msk.f32.vlgmr.msra.gmra.mrb[0].mxu0 %vm261_vm2, %v260_v13 }
 0x1a2   : > { %v333_v16 = vpop.f32.mrb[0].mxu0 }
 0x1a3   : > { %v334_v17 = vadd.f32 %v333_v16, %v253_v15  ;;  %v548_v18 = vpop.f32.mrb[1].mxu0 }
 0x1a5   : > { %552 = vmatmul.mubr.msk.f32.vlgmr.msra.gmra.mrb[0].mxu1 %vm339_vm4, %v334_v17 }
 0x278   : > { %v413_v21 = vpop.f32.mrb[0].mxu1 }
 0x279   : > { %v414_v22 = vadd.f32 %v413_v21, %v338_v19  ;;  %v553_v23 = vpop.f32.mrb[1].mxu1 }
 0x27b   : > { %v420_v24 = vrot.slane %v414_v22, %v419_v20 }
 0x27d   : > { %422 = vbcast.lane.b32.xlu0 %v420_v24, 256 }
 0x2ef   : > { %v423_v29 = vpop.permute.xlu0 %422 }
 0x2f0   : > { %v431_v30 = vrot.slane %v423_v29, %v430_v28 }
 0x2f2   : > { %v433_v31 = vmul.f32 %v431_v30, %v241_v0 }
 0x2f4   : > { %434 = vst [vmem:[%s240_s9] sm:$0xff] %v433_v31 }
 0x2f5   : > { %647 = shalt.err (!%p644_p4)
}
 0x2f6   : > { %s648_s13 = scalar_lea.hbm %s870_s15, 128  ;;  %s652_s26 = scalar_lea.hbm %s919_s5, 256 }
 0x2f7   : > { %p649_p5 = scmp.ne.s32.totalorder %s870_s15, %s648_s13  ;;  %p653_p0 = scmp.lt.u32.totalorder %s870_s15, %s919_s5 }
 0x2f8   : > { %p654_p1 = scmp.lt.u32.totalorder %s652_s26, %s648_s13  ;;  %p656_p6 = scmp.lt.u32.totalorder %s648_s13, %s870_s15 }
 0x2f9   : > { %p650_p8 = pnand %p649_p5, %p928_p11 }
 0x2fa   : > { %p655_p3 = por %p654_p1, %p653_p0 }
 0x2fb   : > { %p651_p9 = pneg %p650_p8 }
 0x2fc   : > { %p657_p12 = por %p656_p6, %p655_p3 }
 0x2fe   : > { %p658_p13 = pnand %p657_p12, %p651_p9 }
 0x300   : > { %661 = shalt.err (!%p658_p13)
}
 0x301   : > { %556 = dma.vmem_to_hbm [thread:$0]  (%p928_p11), %s872_s10, 128, %s870_s15, %s436_s12  }
 0x302 PF: > { %s462_s7 = sand.u32 1, %s688_s18   ;;  %p929_p7 = scmp.ne.s32.totalorder %s924_s6, 0 }
 0x303   : > { %p930_p10 = scmp.ge.s32.totalorder %s700_s21, 2  ;;  %s463_s9 = scalar_lea.sflag [#allocation4], %s462_s7 }
 0x305   : > { %p563_p2 = pnand %p930_p10, %p929_p7 }
 0x307   : > { %683 = dma.done.wait (!%p563_p2), %s463_s9, 128  }
 0x308   : > { %685 = vsyncadd (!%p563_p2), %s463_s9, 4294967168  ;;  %p18_p4 = scmp.ge.s32.totalorder %s762_s24, 4   ;;  %s931_s18 = smov %s692_s19 }
 0x309   : > { %s932_s19 = smov %s696_s20  ;;  %s933_s20 = smov %s774_s27 }
 0x30a   : > { %s934_s21 = smov %s762_s24  ;;  %20 = sbr.rel (!%p18_p4) target bundleno = 5 (0x5), region = 85 }
 0x311   :  { %468 = vsyncpa [#allocation3], 1 }
 0x312   :  { %470 = vsyncpa [#allocation3 + $0x1], 1 }
 0x313   :  { %471 = vsyncpa [#allocation4], 1 }
 0x314   :  { %473 = vsyncpa [#allocation4 + $0x1], 1 }

</bundles_post_ra>
